<compile_context>
chip_gen: v5e
topology: v5e:2x2
jax: 0.10.0
libtpu: 0.0.40
codegen_flags: <defaults>
</compile_context>

<pallas_src>
import functools
import math

import numpy as np

import jax
import jax.numpy as jnp
from jax.experimental import pallas as pl
from jax.experimental.pallas import tpu as pltpu


_LANE = 128          # TPU lane width (output last-dim granularity)
_K_TARGET = 1024     # target contraction-chunk width over c_in
_FIXED_SLACK = 2 << 20


def _round_up(x: int, m: int) -> int:
    return ((x + m - 1) // m) * m


def _sinusoid_table_np(c_in: int, d_model: int) -> np.ndarray:
    """Same construction as the PyTorch FixedEmbedding.__init__ (float32)."""
    position = np.arange(c_in, dtype=np.float32)[:, None]
    div_term = np.exp(np.arange(0, d_model, 2, dtype=np.float32)
                      * -(math.log(10000.0) / d_model))
    ang = position * div_term
    w = np.zeros((c_in, d_model), dtype=np.float32)
    w[:, 0::2] = np.sin(ang)
    w[:, 1::2] = np.cos(ang)
    return w


@functools.lru_cache(maxsize=None)
def _padded_table(c_in, d_model, c_pad, d_pad, dtype_name):
    """Table built once per (c_in, d_model, dtype), zero-padded to (c_pad, d_pad)."""
    wp = np.zeros((c_pad, d_pad), dtype=np.float32)
    wp[:c_in, :d_model] = _sinusoid_table_np(c_in, d_model)
    return jnp.asarray(wp, dtype=jnp.dtype(dtype_name))


def _vmem_capacity_bytes() -> int:
    try:
        return int(pltpu.get_tpu_info().vmem_capacity_bytes)
    except Exception:
        return 64 << 20   # v7x per-core physical VMEM; safe floor on every generation


def _choose_k_chunking(c_in: int):
    """Return (kc, num_k, c_pad): near-equal K chunks with minimal vocab padding."""
    if c_in <= _K_TARGET:
        c_pad = _round_up(c_in, 8 if c_in <= _LANE else _LANE)   # 600 -> 640, not 1024
        return c_pad, 1, c_pad
    num_k = -(-c_in // _K_TARGET)                                # ceil
    kc = _round_up(-(-c_in // num_k), 256)                       # near-equal, 256-aligned
    return kc, num_k, kc * num_k


def _make_kernel(kc: int, num_k: int):
    def kernel(klo_ref, khi_ref, idx_ref, w_ref, o_ref):
        # klo/khi: SMEM (num_tiles,) chunk bounds | idx: (tile, 1) int32
        # w: (c_pad, d_pad) table                 | o: (tile, d_pad) f32
        idx = idx_ref[...]
        tile = idx.shape[0]
        # One-hot column ids built once per grid step (hoisted out of the K loop).
        cols = jax.lax.broadcasted_iota(jnp.int32, (tile, kc), 1)

        if num_k == 1:
            onehot = (cols == idx).astype(w_ref.dtype)
            o_ref[...] = jnp.dot(onehot, w_ref[...],
                                 preferred_element_type=jnp.float32)
        else:
            o_ref[...] = jnp.zeros_like(o_ref)
            i = pl.program_id(0)
            k_lo = klo_ref[i]
            k_hi = khi_ref[i]

            def body(k, carry):
                base = pl.multiple_of(k * kc, kc)
                # Compare against (idx - base): (tile, 1) subtract, one vector compare.
                onehot = (cols == (idx - base)).astype(w_ref.dtype)
                o_ref[...] += jnp.dot(onehot, w_ref[pl.ds(base, kc), :],
                                      preferred_element_type=jnp.float32)
                return carry

            # Only visit chunks this tile's indices can actually hit.
            jax.lax.fori_loop(k_lo, k_hi, body, 0)

    return kernel


def fixed_embedding(x, c_in: int, d_model: int, *,
                    table_dtype=jnp.float32, use_pallas=None):
    """FixedEmbedding forward: gather rows of the fixed sinusoidal table (f32 output)."""
    assert d_model % 2 == 0, "d_model must be even (matches the PyTorch module)"
    orig_shape = x.shape
    flat = jnp.asarray(x).reshape(-1).astype(jnp.int32)
    n = int(flat.shape[0])
    if n == 0:
        return jnp.zeros((*orig_shape, d_model), jnp.float32)

    d_pad = _round_up(d_model, _LANE)
    kc, num_k, c_pad = _choose_k_chunking(c_in)
    dtype = jnp.dtype(table_dtype)
    w = _padded_table(c_in, d_model, c_pad, d_pad, dtype.name)

    if use_pallas is None:
        # Tiny problems: pallas_call launch/DMA overhead exceeds the whole gather.
        use_pallas = n >= 1024 and c_in * d_model >= 4096

    # Per-generation VMEM budgeting (v5e/v6e 128 MiB, v7x 64 MiB) with ~8 MiB headroom.
    vmem_cap = _vmem_capacity_bytes()
    usable = max(vmem_cap - (8 << 20), 16 << 20)
    itemsize = dtype.itemsize
    # Conservative: budget a double-buffered table so the non-Buffered(1) fallback also
    # fits; when Buffered(1) works the difference becomes compiler headroom.
    table_bytes = 2 * c_pad * d_pad * itemsize

    if use_pallas and table_bytes + _FIXED_SLACK + (1 << 20) > usable:
        # TODO(synk): add a table-blocked second ("arbitrary") grid axis for tables too
        # large to keep resident in VMEM; fall back to the XLA gather for now.
        use_pallas = False

    if not use_pallas:
        out = jnp.take(w[:c_in, :d_model].astype(jnp.float32), flat, axis=0)
        return out.reshape(*orig_shape, d_model)

    # Row tile: budget against VMEM (double-buffered output + lane-inflated index
    # blocks + one-hot/iota intermediates), target >= ~2 MiB of output per step, and
    # cap so the grid keeps at least 2 steps (both v7x TensorCores busy).
    row_bytes = 2 * d_pad * 4 + 2 * _LANE * 4 + kc * (itemsize + 4)
    budget_rows = max(_LANE, (usable - table_bytes - _FIXED_SLACK) // row_bytes)
    tile_cap = min(4096, max(1024, (2 << 20) // (d_pad * 4)))
    tile = max(_LANE, min(tile_cap, (budget_rows // _LANE) * _LANE))
    if n >= 2 * _LANE:
        tile = min(tile, _round_up((n + 1) // 2, _LANE))
    else:
        tile = _round_up(max(n, 8), 8)
    n_pad = _round_up(n, tile)
    num_tiles = n_pad // tile

    # Edge-pad so padded rows reuse a real index (keeps per-tile chunk bounds tight).
    flat_p = jnp.pad(flat, (0, n_pad - n), mode="edge") if n_pad != n else flat
    idx2d = flat_p.reshape(n_pad, 1)

    # Per-tile chunk bounds, scalar-prefetched into SMEM.
    if num_k > 1:
        blocks = flat_p.reshape(num_tiles, tile)
        bmin = jnp.clip(jnp.min(blocks, axis=1), 0, c_pad - 1)
        bmax = jnp.clip(jnp.max(blocks, axis=1), 0, c_pad - 1)
        k_lo = (bmin // kc).astype(jnp.int32)
        k_hi = (bmax // kc + 1).astype(jnp.int32)
    else:
        k_lo = jnp.zeros((num_tiles,), jnp.int32)
        k_hi = jnp.ones((num_tiles,), jnp.int32)

    vmem_need = (table_bytes + _FIXED_SLACK
                 + 2 * tile * _LANE * 4          # lane-inflated (tile, 1) index blocks
                 + 2 * tile * d_pad * 4          # output blocks
                 + tile * kc * (itemsize + 4))   # one-hot + iota intermediates
    vmem_limit = int(min(max(vmem_need, 16 << 20), usable))

    kernel = _make_kernel(kc, num_k)

    def call(single_buffer_table: bool):
        tbl_kwargs = dict(pipeline_mode=pl.Buffered(1)) if single_buffer_table else {}
        return pl.pallas_call(
            kernel,
            out_shape=jax.ShapeDtypeStruct((n_pad, d_pad), jnp.float32),
            grid_spec=pltpu.PrefetchScalarGridSpec(
                num_scalar_prefetch=2,
                grid=(num_tiles,),
                in_specs=[
                    pl.BlockSpec((tile, 1), lambda i, klo, khi: (i, 0)),      # indices
                    pl.BlockSpec((c_pad, d_pad), lambda i, klo, khi: (0, 0),  # table
                                 **tbl_kwargs),
                ],
                out_specs=pl.BlockSpec((tile, d_pad), lambda i, klo, khi: (i, 0)),
            ),
            compiler_params=pltpu.CompilerParams(
                dimension_semantics=("parallel",),   # shard row tiles across TCs (v7x)
                vmem_limit_bytes=vmem_limit,
            ),
        )(k_lo, k_hi, idx2d, w)

    try:
        out = call(True)       # single-buffered constant table (saves VMEM)
    except Exception:
        out = call(False)      # fallback if pipeline_mode / Buffered(1) is unsupported

    # Skip the epilogue slice entirely when no row/lane padding was added.
    if n_pad != n or d_pad != d_model:
        out = out[:n, :d_model]
    return out.reshape(*orig_shape, d_model)


if __name__ == "__main__":
    key = jax.random.PRNGKey(0)
    k1, k2, k3, k4 = jax.random.split(key, 4)

    def ref_gather(xv, c_in, d_model):
        tab = jnp.asarray(_sinusoid_table_np(c_in, d_model))
        return jnp.take(tab, xv.reshape(-1), axis=0).reshape(*xv.shape, d_model)

    # Case 1: small demo shapes (B=2, L=8, c_in=32, d_model=32); force the Pallas path
    # so the kernel is exercised even though auto-dispatch would pick jnp.take here.
    c_in1, d_model1 = 32, 32
    x1 = jax.random.randint(k1, (2, 8), 0, c_in1, dtype=jnp.int32)
    y1 = jax.block_until_ready(fixed_embedding(x1, c_in1, d_model1, use_pallas=True))
    assert y1.shape == (2, 8, d_model1) and y1.dtype == jnp.float32
    assert jnp.allclose(y1, ref_gather(x1, c_in1, d_model1), atol=1e-6), "case 1 mismatch"

    # Case 2: lane padding (d_model=96), reduced vocab padding (600 -> 640, one chunk),
    # and a 2-step "parallel" grid.
    c_in2, d_model2 = 600, 96
    x2 = jax.random.randint(k2, (4, 300), 0, c_in2, dtype=jnp.int32)
    y2 = jax.block_until_ready(fixed_embedding(x2, c_in2, d_model2, use_pallas=True))
    assert jnp.allclose(y2, ref_gather(x2, c_in2, d_model2), atol=1e-6), "case 2 mismatch"

    # Case 3: chunked contraction (c_in=3000 -> 3 x 1024 chunks) with per-tile chunk
    # skipping: the first tile holds clustered indices (visits one chunk), the second
    # spans the full range (visits all three).
    c_in3, d_model3 = 3000, 64
    x3 = jnp.concatenate([
        jax.random.randint(k3, (1, 640), 0, 200, dtype=jnp.int32),
        jax.random.randint(k4, (1, 640), 0, c_in3, dtype=jnp.int32),
    ], axis=0)
    y3 = jax.block_until_ready(fixed_embedding(x3, c_in3, d_model3, use_pallas=True))
    assert jnp.allclose(y3, ref_gather(x3, c_in3, d_model3), atol=1e-6), "case 3 mismatch"

    print("KERNEL_OK")
</pallas_src>

<mosaic_0001>
module attributes {stable_mosaic.version = 11 : i64} {
  func.func @kernel(%arg0: i32, %arg1: memref<1xi32, #tpu.memory_space<smem>>, %arg2: memref<1xi32, #tpu.memory_space<smem>>, %arg3: memref<16x1xi32, #tpu.memory_space<vmem>>, %arg4: memref<32x128xf32, #tpu.memory_space<vmem>>, %arg5: memref<16x128xf32, #tpu.memory_space<vmem>>) attributes {dimension_semantics = [#tpu.dimension_semantics<parallel>], iteration_bounds = array<i64: 1>, scalar_prefetch = 2 : i64, scratch_operands = 0 : i64, tpu.core_type = #tpu.core_type<tc>, window_params = [{transform_indices = @transform_0, window_bounds = array<i64: 16, 1>}, {pipeline_mode = #tpu.pipeline_mode<synchronous>, transform_indices = @transform_1, window_bounds = array<i64: 32, 128>}, {transform_indices = @transform_2, window_bounds = array<i64: 16, 128>}]} {
    %c0 = arith.constant 0 : index
    %c0_0 = arith.constant 0 : index
    %0 = vector.load %arg3[%c0, %c0_0] : memref<16x1xi32, #tpu.memory_space<vmem>>, vector<16x1xi32>
    %1 = tpu.iota {dimensions = array<i32: 1>} : vector<16x32xi32>
    %2 = vector.broadcast %0 : vector<16x1xi32> to vector<16x32xi32>
    %3 = arith.cmpi eq, %1, %2 : vector<16x32xi32>
    %4 = arith.extui %3 : vector<16x32xi1> to vector<16x32xi32>
    %5 = arith.sitofp %4 : vector<16x32xi32> to vector<16x32xf32>
    %c0_1 = arith.constant 0 : index
    %c0_2 = arith.constant 0 : index
    %6 = vector.load %arg4[%c0_1, %c0_2] : memref<32x128xf32, #tpu.memory_space<vmem>>, vector<32x128xf32>
    %cst = arith.constant dense<0.000000e+00> : vector<16x128xf32>
    %7 = tpu.matmul %5, %6, %cst {dimension_numbers = #tpu.dot_dimension_numbers<[1], [0], [0], [1], [0, 0, 1, 1], [], []>} : vector<16x32xf32>, vector<32x128xf32>, vector<16x128xf32> -> vector<16x128xf32>
    %c0_3 = arith.constant 0 : index
    %c0_4 = arith.constant 0 : index
    %8 = vector.load %arg5[%c0_3, %c0_4] : memref<16x128xf32, #tpu.memory_space<vmem>>, vector<16x128xf32>
    tpu.vector_store %arg5[%c0_3, %c0_4], %7 {strides = array<i32>} : memref<16x128xf32, #tpu.memory_space<vmem>>, vector<16x128xf32>,
    return
  }
  func.func @transform_0(%arg0: i32, %arg1: memref<1xi32, #tpu.memory_space<smem>>, %arg2: memref<1xi32, #tpu.memory_space<smem>>) -> (i32, i32) {
    %c0_i32 = arith.constant 0 : i32
    %c0_i32_0 = arith.constant 0 : i32
    return %arg0, %c0_i32 : i32, i32
  }
  func.func @transform_1(%arg0: i32, %arg1: memref<1xi32, #tpu.memory_space<smem>>, %arg2: memref<1xi32, #tpu.memory_space<smem>>) -> (i32, i32) {
    %c0_i32 = arith.constant 0 : i32
    %c0_i32_0 = arith.constant 0 : i32
    %c0_i32_1 = arith.constant 0 : i32
    return %c0_i32, %c0_i32_0 : i32, i32
  }
  func.func @transform_2(%arg0: i32, %arg1: memref<1xi32, #tpu.memory_space<smem>>, %arg2: memref<1xi32, #tpu.memory_space<smem>>) -> (i32, i32) {
    %c0_i32 = arith.constant 0 : i32
    %c0_i32_0 = arith.constant 0 : i32
    return %arg0, %c0_i32 : i32, i32
  }
}

module attributes {stable_mosaic.version = 11 : i64} {
  func.func @kernel(%arg0: i32, %arg1: memref<1xi32, #tpu.memory_space<smem>>, %arg2: memref<1xi32, #tpu.memory_space<smem>>, %arg3: memref<16x1xi32, #tpu.memory_space<vmem>>, %arg4: memref<32x128xf32, #tpu.memory_space<vmem>>, %arg5: memref<16x128xf32, #tpu.memory_space<vmem>>) attributes {dimension_semantics = [#tpu.dimension_semantics<parallel>], iteration_bounds = array<i64: 1>, scalar_prefetch = 2 : i64, scratch_operands = 0 : i64, tpu.core_type = #tpu.core_type<tc>, window_params = [{transform_indices = @transform_0, window_bounds = array<i64: 16, 1>}, {pipeline_mode = #tpu.pipeline_mode<synchronous>, transform_indices = @transform_1, window_bounds = array<i64: 32, 128>}, {transform_indices = @transform_2, window_bounds = array<i64: 16, 128>}]} {
    %c0 = arith.constant 0 : index
    %c0_0 = arith.constant 0 : index
    %0 = vector.load %arg3[%c0, %c0_0] : memref<16x1xi32, #tpu.memory_space<vmem>>, vector<16x1xi32>
    %1 = tpu.iota {dimensions = array<i32: 1>} : vector<16x32xi32>
    %2 = vector.broadcast %0 : vector<16x1xi32> to vector<16x32xi32>
    %3 = arith.cmpi eq, %1, %2 : vector<16x32xi32>
    %4 = arith.extui %3 : vector<16x32xi1> to vector<16x32xi32>
    %5 = arith.sitofp %4 : vector<16x32xi32> to vector<16x32xf32>
    %c0_1 = arith.constant 0 : index
    %c0_2 = arith.constant 0 : index
    %6 = vector.load %arg4[%c0_1, %c0_2] : memref<32x128xf32, #tpu.memory_space<vmem>>, vector<32x128xf32>
    %cst = arith.constant dense<0.000000e+00> : vector<16x128xf32>
    %7 = tpu.matmul %5, %6, %cst {dimension_numbers = #tpu.dot_dimension_numbers<[1], [0], [0], [1], [0, 0, 1, 1], [], []>} : vector<16x32xf32>, vector<32x128xf32>, vector<16x128xf32> -> vector<16x128xf32>
    %c0_3 = arith.constant 0 : index
    %c0_4 = arith.constant 0 : index
    %8 = vector.load %arg5[%c0_3, %c0_4] : memref<16x128xf32, #tpu.memory_space<vmem>>, vector<16x128xf32>
    tpu.vector_store %arg5[%c0_3, %c0_4], %7 {strides = array<i32>} : memref<16x128xf32, #tpu.memory_space<vmem>>, vector<16x128xf32>,
    return
  }
  func.func @transform_0(%arg0: i32, %arg1: memref<1xi32, #tpu.memory_space<smem>>, %arg2: memref<1xi32, #tpu.memory_space<smem>>) -> (i32, i32) {
    %c0_i32 = arith.constant 0 : i32
    %c0_i32_0 = arith.constant 0 : i32
    return %arg0, %c0_i32 : i32, i32
  }
  func.func @transform_1(%arg0: i32, %arg1: memref<1xi32, #tpu.memory_space<smem>>, %arg2: memref<1xi32, #tpu.memory_space<smem>>) -> (i32, i32) {
    %c0_i32 = arith.constant 0 : i32
    %c0_i32_0 = arith.constant 0 : i32
    %c0_i32_1 = arith.constant 0 : i32
    return %c0_i32, %c0_i32_0 : i32, i32
  }
  func.func @transform_2(%arg0: i32, %arg1: memref<1xi32, #tpu.memory_space<smem>>, %arg2: memref<1xi32, #tpu.memory_space<smem>>) -> (i32, i32) {
    %c0_i32 = arith.constant 0 : i32
    %c0_i32_0 = arith.constant 0 : i32
    return %arg0, %c0_i32 : i32, i32
  }
}

</mosaic_0001>

<bundles_post_ra>
// kernel: tpu_custom_call.1
= control target key start
LH: loop header
LB: loop body
LE: loop exit
PB: predicated region body
PF: predicated region fallthrough
CT: control target
= control target key end

     0   :  { %11 = vsyncpa [#allocation6], 0  ;;  %s219_s0 = inlined_call_operand.<no memory space> [shape: s32[1], index: 0, kind: input, shape index: {}]   ;;  %s220_s1 = inlined_call_operand.<no memory space> [shape: s32[1], index: 1, kind: input, shape index: {}]   ;;  %s221_s2 = inlined_call_operand.vmem [shape: s32[16,1], index: 2, kind: input, shape index: {}]   ;;  %s222_s3 = inlined_call_operand.hbm [shape: f32[32,128], index: 3, kind: input, shape index: {}]   ;;  %s223_s4 = inlined_call_operand.hbm [shape: f32[16,128], index: 4, kind: output, shape index: {}]  }
   0x1   :  { %12 = vsyncpa [#allocation7], 0  ;;  %s19_s17 = sshll.u32 %s222_s3, 4  ;;  %s170_s0 = smov [#allocation5]   ;;  %s20_s17 = int_to_ptr.hbm [resolvable:$true] %s19_s17 }
   0x2   :  { %s21_s18 = sshll.u32 %s170_s0, 4  ;;  %s171_s1 = smov 128   ;;  %s22_s18 = int_to_ptr.vmem [resolvable:$true] %s21_s18 }
   0x3   :  { %s172_s19 = smov 8  }
   0x4   :  { %27 = dma.hbm_to_vmem [thread:$0]  %s20_s17, 512, %s22_s18, [#allocation6], %s171_s1, %s171_s1, %s172_s19  }
   0x5   :  { %166 = dma.done.wait [#allocation6], 512  }
   0x6   :  { %167 = vsyncadd [#allocation6], 4294966784  ;;  %v173_v0 = vmov 0   ;;  %v32_v1 = vld [vmem:[%s221_s2] sm:$0xff]  ;;  %v51_v2 = vld [vmem:[#allocation5 + $0x18] sm:$0xff]  ;;  %v34_v7 = vlaneseq  ;;  %vm52_vm0 = vcmask 261120  }
   0x7   :  { %117 = vset.pattern.permute.xlu0 %v173_v0  ;;  %71 = vmatpush.msra.mxu0 %v51_v2  ;;  %v50_v3 = vld [vmem:[#allocation5 + $0x10] sm:$0xff]  ;;  %v49_v4 = vld [vmem:[#allocation5 + $0x8] sm:$0xff]  ;;  %v48_v6 = vld [vmem:[#allocation5] sm:$0xff]  ;;  %v174_v10 = vmov 0.0   ;;  %s90_s26 = sshll.u32 %s223_s4, 4  ;;  %s91_s26 = int_to_ptr.hbm [resolvable:$true] %s90_s26 }
   0x8   :  { %37 = vperm.xlu0 %117, %v32_v1   ;;  %107 = vmatpush.msra.mxu1 %v51_v2  ;;  %v33_v5 = vld [vmem:[%s221_s2 + $0x8] sm:$0xff]  ;;  %v35_v8 = vand.u32 127, %v34_v7  ;;  %s175_s2 = smov [#allocation8]  }
   0x9   :  { %72 = vmatpush.msra.mxu0 %v50_v3  ;;  %s88_s23 = sshll.u32 %s175_s2, 4  ;;  %s89_s23 = int_to_ptr.vmem [resolvable:$true] %s88_s23 }
   0xa   :  { %108 = vmatpush.msra.mxu1 %v50_v3 }
   0xb   :  { %73 = vmatpush.msra.mxu0 %v49_v4 }
   0xc   :  { %109 = vmatpush.msra.mxu1 %v49_v4 }
   0xd   :  { %74 = vmatpush.msra.mxu0 %v48_v6 }
   0xe   :  { %110 = vmatpush.msra.mxu1 %v48_v6 }
  0x10   :  { %40 = vperm.xlu0 %117, %v33_v5  }
  0x7a   :  { %v38_v9 = vpop.permute.xlu0 %37 }
  0x7b   :  { %vm42_vm1 = vcmp.eq.s32.totalorder %v35_v8, %v38_v9 }
  0x7c   :  { %v103_v11 = vsel %vm42_vm1, 1.0, %v174_v10 }
  0x7d   :  { %105 = vmatmul.msk.f32.vlgmr.msra.gmra.mxu0 %vm52_vm0, %v103_v11 }
  0x82   :  { %v41_v12 = vpop.permute.xlu0 %40 }
  0x83   :  { %vm43_vm2 = vcmp.eq.s32.totalorder %v35_v8, %v41_v12 }
  0x84   :  { %v104_v13 = vsel %vm43_vm2, 1.0, %v174_v10 }
  0x85   :  { %106 = vmatmul.msk.f32.vlgmr.msra.gmra.mxu1 %vm52_vm0, %v104_v13 }
  0xfa   :  { %v76_v14 = vpop.f32.mrf.mxu0 }
  0xfb   :  { %82 = vst [vmem:[#allocation8] sm:$0xff] %v76_v14 }
 0x102   :  { %v79_v15 = vpop.f32.mrf.mxu1 }
 0x103   :  { %83 = vst [vmem:[#allocation8 + $0x8] sm:$0xff] %v79_v15 }
 0x104   :  { %96 = dma.vmem_to_hbm [thread:$0]  %s89_s23, 256, %s91_s26, [#allocation7], %s171_s1, %s171_s1, %s172_s19  }
 0x105   :  { %168 = dma.done.wait [#allocation7], 256  }
 0x106   :  { %169 = vsyncadd [#allocation7], 4294967040 }
 0x107   :  { %101 = vsyncpa [#allocation6], 1 }
 0x108   :  { %102 = vsyncpa [#allocation7], 1 }

// kernel: tpu_custom_call.1
= control target key start
LH: loop header
LB: loop body
LE: loop exit
PB: predicated region body
PF: predicated region fallthrough
CT: control target
= control target key end

     0   :  { %11 = vsyncpa [#allocation6], 0  ;;  %s219_s0 = inlined_call_operand.<no memory space> [shape: s32[1], index: 0, kind: input, shape index: {}]   ;;  %s220_s1 = inlined_call_operand.<no memory space> [shape: s32[1], index: 1, kind: input, shape index: {}]   ;;  %s221_s2 = inlined_call_operand.vmem [shape: s32[16,1], index: 2, kind: input, shape index: {}]   ;;  %s222_s3 = inlined_call_operand.hbm [shape: f32[32,128], index: 3, kind: input, shape index: {}]   ;;  %s223_s4 = inlined_call_operand.hbm [shape: f32[16,128], index: 4, kind: output, shape index: {}]  }
   0x1   :  { %12 = vsyncpa [#allocation7], 0  ;;  %s19_s17 = sshll.u32 %s222_s3, 4  ;;  %s170_s0 = smov [#allocation5]   ;;  %s20_s17 = int_to_ptr.hbm [resolvable:$true] %s19_s17 }
   0x2   :  { %s21_s18 = sshll.u32 %s170_s0, 4  ;;  %s171_s1 = smov 128   ;;  %s22_s18 = int_to_ptr.vmem [resolvable:$true] %s21_s18 }
   0x3   :  { %s172_s19 = smov 8  }
   0x4   :  { %27 = dma.hbm_to_vmem [thread:$0]  %s20_s17, 512, %s22_s18, [#allocation6], %s171_s1, %s171_s1, %s172_s19  }
   0x5   :  { %166 = dma.done.wait [#allocation6], 512  }
   0x6   :  { %167 = vsyncadd [#allocation6], 4294966784  ;;  %v173_v0 = vmov 0   ;;  %v32_v1 = vld [vmem:[%s221_s2] sm:$0xff]  ;;  %v51_v2 = vld [vmem:[#allocation5 + $0x18] sm:$0xff]  ;;  %v34_v7 = vlaneseq  ;;  %vm52_vm0 = vcmask 261120  }
   0x7   :  { %117 = vset.pattern.permute.xlu0 %v173_v0  ;;  %71 = vmatpush.msra.mxu0 %v51_v2  ;;  %v50_v3 = vld [vmem:[#allocation5 + $0x10] sm:$0xff]  ;;  %v49_v4 = vld [vmem:[#allocation5 + $0x8] sm:$0xff]  ;;  %v48_v6 = vld [vmem:[#allocation5] sm:$0xff]  ;;  %v174_v10 = vmov 0.0   ;;  %s90_s26 = sshll.u32 %s223_s4, 4  ;;  %s91_s26 = int_to_ptr.hbm [resolvable:$true] %s90_s26 }
   0x8   :  { %37 = vperm.xlu0 %117, %v32_v1   ;;  %107 = vmatpush.msra.mxu1 %v51_v2  ;;  %v33_v5 = vld [vmem:[%s221_s2 + $0x8] sm:$0xff]  ;;  %v35_v8 = vand.u32 127, %v34_v7  ;;  %s175_s2 = smov [#allocation8]  }
   0x9   :  { %72 = vmatpush.msra.mxu0 %v50_v3  ;;  %s88_s23 = sshll.u32 %s175_s2, 4  ;;  %s89_s23 = int_to_ptr.vmem [resolvable:$true] %s88_s23 }
   0xa   :  { %108 = vmatpush.msra.mxu1 %v50_v3 }
   0xb   :  { %73 = vmatpush.msra.mxu0 %v49_v4 }
   0xc   :  { %109 = vmatpush.msra.mxu1 %v49_v4 }
   0xd   :  { %74 = vmatpush.msra.mxu0 %v48_v6 }
   0xe   :  { %110 = vmatpush.msra.mxu1 %v48_v6 }
  0x10   :  { %40 = vperm.xlu0 %117, %v33_v5  }
  0x7a   :  { %v38_v9 = vpop.permute.xlu0 %37 }
  0x7b   :  { %vm42_vm1 = vcmp.eq.s32.totalorder %v35_v8, %v38_v9 }
  0x7c   :  { %v103_v11 = vsel %vm42_vm1, 1.0, %v174_v10 }
  0x7d   :  { %105 = vmatmul.msk.f32.vlgmr.msra.gmra.mxu0 %vm52_vm0, %v103_v11 }
  0x82   :  { %v41_v12 = vpop.permute.xlu0 %40 }
  0x83   :  { %vm43_vm2 = vcmp.eq.s32.totalorder %v35_v8, %v41_v12 }
  0x84   :  { %v104_v13 = vsel %vm43_vm2, 1.0, %v174_v10 }
  0x85   :  { %106 = vmatmul.msk.f32.vlgmr.msra.gmra.mxu1 %vm52_vm0, %v104_v13 }
  0xfa   :  { %v76_v14 = vpop.f32.mrf.mxu0 }
  0xfb   :  { %82 = vst [vmem:[#allocation8] sm:$0xff] %v76_v14 }
 0x102   :  { %v79_v15 = vpop.f32.mrf.mxu1 }
 0x103   :  { %83 = vst [vmem:[#allocation8 + $0x8] sm:$0xff] %v79_v15 }
 0x104   :  { %96 = dma.vmem_to_hbm [thread:$0]  %s89_s23, 256, %s91_s26, [#allocation7], %s171_s1, %s171_s1, %s172_s19  }
 0x105   :  { %168 = dma.done.wait [#allocation7], 256  }
 0x106   :  { %169 = vsyncadd [#allocation7], 4294967040 }
 0x107   :  { %101 = vsyncpa [#allocation6], 1 }
 0x108   :  { %102 = vsyncpa [#allocation7], 1 }

</bundles_post_ra>
